<compile_context>
chip_gen: v5e
topology: v5e:2x2
jax: 0.10.0
libtpu: 0.0.40
codegen_flags: <defaults>
</compile_context>

<pallas_src>
import functools

import jax
import jax.numpy as jnp
from jax import lax
from jax.experimental import pallas as pl
from jax.experimental.pallas import tpu as pltpu

LN_EPS = 1e-5   # PyTorch nn.LayerNorm default
LANE = 128      # TPU lane width


def _round_up(x, m):
    return ((x + m - 1) // m) * m


def _cdiv(a, b):
    return -(-a // b)


def _layernorm(h, gamma, beta, n_valid):
    """LayerNorm over the last axis where only the first `n_valid` lanes are real.

    Padded lanes of `h` are exactly zero by construction, so sums over the
    padded axis equal sums over the real features and no masking is needed.
    Uses var = E[h^2] - mean^2 (no iota/compare/select). gamma/beta are zero
    on padded lanes, which keeps padded lanes zero on output.
    """
    inv_n = 1.0 / float(n_valid)
    mean = jnp.sum(h, axis=-1, keepdims=True) * inv_n
    var = jnp.sum(h * h, axis=-1, keepdims=True) * inv_n - mean * mean
    inv = lax.rsqrt(var + LN_EPS)
    return (h - mean) * inv * gamma + beta


def _ln_actor_kernel(
    x_ref,
    w1_ref, b1_ref, g1_ref, be1_ref,
    w2_ref, b2_ref, g2_ref, be2_ref,
    w3_ref, b3_ref,
    o_ref,
    *, hidden1, hidden2,
):
    mm_dtype = w1_ref.dtype          # bf16 (fast path) or f32 (parity path)
    x = x_ref[...].astype(mm_dtype)

    # ---- layer 1: Linear + ReLU + LayerNorm (f32 accumulate / f32 VPU) ----
    h = jnp.dot(x, w1_ref[...], preferred_element_type=jnp.float32) + b1_ref[...]
    h = jnp.maximum(h, 0.0)
    h = _layernorm(h, g1_ref[...], be1_ref[...], hidden1)

    # ---- layer 2: Linear + ReLU + LayerNorm ----
    h = jnp.dot(h.astype(mm_dtype), w2_ref[...],
                preferred_element_type=jnp.float32) + b2_ref[...]
    h = jnp.maximum(h, 0.0)
    h = _layernorm(h, g2_ref[...], be2_ref[...], hidden2)

    # ---- layer 3: Linear + tanh (real action width, no lane padding) ----
    h = jnp.dot(h.astype(mm_dtype), w3_ref[...],
                preferred_element_type=jnp.float32) + b3_ref[...]
    o_ref[...] = jnp.tanh(h).astype(o_ref.dtype)


def _choose_tiling(batch, *, max_tile=512):
    """Pick (tile_rows, padded_batch, n_steps).

    * Few, large tiles: per-grid-step overhead (~0.35 us) dominates tiny steps.
    * Even step count (>=2) when there are enough rows, so the "parallel"
      batch axis can shard across both TensorCores on v7x.
    * Tile capped at max_tile rows to avoid the vreg-spill regime.
    * Tile derived from the step count, so batch padding stays small.
    """
    n = _cdiv(_round_up(batch, 8), max_tile)
    if batch >= 16:
        n = max(n, 2)
    if n > 1 and n % 2 == 1:
        n += 1
    tb = _round_up(_cdiv(batch, n), 8)
    return tb, tb * n, n


def ln_actor_forward(x, params, *, matmul_dtype=jnp.bfloat16, max_block_batch=512):
    """x: [B, state_dim] float32. Returns [B, action_dim] float32."""
    batch, state_dim = x.shape
    action_dim = params["action_dim"]
    hidden1 = params["hidden1"]
    hidden2 = params["hidden2"]

    w1, b1, g1, be1 = params["w1"], params["b1"], params["g1"], params["be1"]
    w2, b2, g2, be2 = params["w2"], params["b2"], params["g2"], params["be2"]
    w3, b3 = params["w3"], params["b3"]

    # Matmul operands in matmul_dtype (bf16 -> native MXU rate + half the
    # resident-weight DMA/VMEM). Biases / LN params / accumulators stay f32.
    w1 = w1.astype(matmul_dtype)
    w2 = w2.astype(matmul_dtype)
    w3 = w3.astype(matmul_dtype)

    tb, b_pad, n_steps = _choose_tiling(batch, max_tile=max_block_batch)
    if b_pad != batch:
        x = jnp.pad(x, ((0, b_pad - batch), (0, 0)))
    grid = (n_steps,)

    kernel = functools.partial(_ln_actor_kernel, hidden1=hidden1, hidden2=hidden2)

    def resident(arr):  # weights/biases: same block every step -> no re-DMA
        return pl.BlockSpec(arr.shape, lambda i: (0, 0))

    in_specs = [
        pl.BlockSpec((tb, state_dim), lambda i: (i, 0)),   # x pipelined over batch
        resident(w1), resident(b1), resident(g1), resident(be1),
        resident(w2), resident(b2), resident(g2), resident(be2),
        resident(w3), resident(b3),
    ]
    # Real action width on output (last block dim == full array dim): HBM
    # writeback is b_pad x action_dim, not a 128-lane padded slab.
    out_specs = pl.BlockSpec((tb, action_dim), lambda i: (i, 0))

    param_list = [w1, b1, g1, be1, w2, b2, g2, be2, w3, b3]
    flops = int(2 * b_pad * (w1.shape[0] * w1.shape[1]
                             + w2.shape[0] * w2.shape[1]
                             + w3.shape[0] * w3.shape[1]))
    transcendentals = int(b_pad * (action_dim + 2))        # tanh lanes + 2 rsqrt/row
    bytes_accessed = int(x.size * x.dtype.itemsize
                         + sum(int(p.size) * p.dtype.itemsize for p in param_list)
                         + b_pad * action_dim * 4)

    out = pl.pallas_call(
        kernel,
        out_shape=jax.ShapeDtypeStruct((b_pad, action_dim), jnp.float32),
        grid=grid,
        in_specs=in_specs,
        out_specs=out_specs,
        compiler_params=pltpu.CompilerParams(
            # Footprint is far below VMEM limits on every generation; no
            # vmem_limit_bytes needed. Tile size is driven by grid-step count
            # and vreg pressure, not VMEM capacity.
            dimension_semantics=("parallel",),
        ),
        cost_estimate=pl.CostEstimate(
            flops=flops,
            transcendentals=transcendentals,
            bytes_accessed=bytes_accessed,
        ),
    )(x, w1, b1, g1, be1, w2, b2, g2, be2, w3, b3)

    return out[:batch]   # drop batch padding; action axis was never padded


def make_params(key, state_dim, action_dim, hidden1, hidden2):
    """Deterministic synthetic parameters matching LN_Actor's shapes.

    Linear weights are generated in JAX layout [in, out] (== PyTorch [out,in].T).
    Hidden feature axes are zero-padded to 128 lanes; the action output axis
    is left at its real width.
    """
    keys = jax.random.split(key, 3)
    h1p = _round_up(hidden1, LANE)
    h2p = _round_up(hidden2, LANE)

    def lin(k, fan_in, fan_out, in_pad, out_pad):
        bound = 1.0 / jnp.sqrt(jnp.float32(fan_in))
        kw, kb = jax.random.split(k)
        w = jax.random.uniform(kw, (fan_in, fan_out), jnp.float32, -bound, bound)
        b = jax.random.uniform(kb, (1, fan_out), jnp.float32, -bound, bound)
        w = jnp.pad(w, ((0, in_pad - fan_in), (0, out_pad - fan_out)))
        b = jnp.pad(b, ((0, 0), (0, out_pad - fan_out)))
        return w, b

    w1, b1 = lin(keys[0], state_dim, hidden1, state_dim, h1p)
    w2, b2 = lin(keys[1], hidden1, hidden2, h1p, h2p)
    w3, b3 = lin(keys[2], hidden2, action_dim, h2p, action_dim)  # out axis unpadded

    # LayerNorm affine params (PyTorch init: ones / zeros); zero on padded lanes
    # so padded hidden lanes stay zero through each LN.
    g1 = jnp.pad(jnp.ones((1, hidden1), jnp.float32), ((0, 0), (0, h1p - hidden1)))
    be1 = jnp.zeros((1, h1p), jnp.float32)
    g2 = jnp.pad(jnp.ones((1, hidden2), jnp.float32), ((0, 0), (0, h2p - hidden2)))
    be2 = jnp.zeros((1, h2p), jnp.float32)

    return dict(w1=w1, b1=b1, g1=g1, be1=be1,
                w2=w2, b2=b2, g2=g2, be2=be2,
                w3=w3, b3=b3,
                state_dim=state_dim, action_dim=action_dim,
                hidden1=hidden1, hidden2=hidden2)


def reference_forward(x, p):
    """Plain-JAX reference mirroring the PyTorch forward (unpadded f32 math)."""
    sd, ad = p["state_dim"], p["action_dim"]
    h1, h2 = p["hidden1"], p["hidden2"]
    w1, b1 = p["w1"][:sd, :h1], p["b1"][:, :h1]
    g1, be1 = p["g1"][:, :h1], p["be1"][:, :h1]
    w2, b2 = p["w2"][:h1, :h2], p["b2"][:, :h2]
    g2, be2 = p["g2"][:, :h2], p["be2"][:, :h2]
    w3, b3 = p["w3"][:h2, :ad], p["b3"][:, :ad]

    def ln(h, g, b):
        m = jnp.mean(h, -1, keepdims=True)
        v = jnp.mean((h - m) ** 2, -1, keepdims=True)
        return (h - m) / jnp.sqrt(v + LN_EPS) * g + b

    h = jax.nn.relu(x @ w1 + b1)
    h = ln(h, g1, be1)
    h = jax.nn.relu(h @ w2 + b2)
    h = ln(h, g2, be2)
    return jnp.tanh(h @ w3 + b3)
    # NOTE: the spec'd PyTorch forward returns tanh(...) without max_action
    # scaling (max_action is stored but unused), so neither the kernel nor
    # this reference applies it.


if __name__ == "__main__":
    # Small shapes consistent with the module's forward.
    batch = 128
    state_dim = 16
    action_dim = 8
    hidden1 = 32
    hidden2 = 32

    key = jax.random.PRNGKey(0)
    kx, kp = jax.random.split(key)

    x = jax.random.normal(kx, (batch, state_dim), jnp.float32)
    params = make_params(kp, state_dim, action_dim, hidden1, hidden2)

    ref = reference_forward(x, params)

    # Exact-parity path: f32 MXU operands. (Tiling heuristic -> grid=(2,),
    # exercising the batch pipeline / both-TC split without tiny steps.)
    out_f32 = jax.block_until_ready(
        ln_actor_forward(x, params, matmul_dtype=jnp.float32))
    assert out_f32.shape == (batch, action_dim)
    assert jnp.allclose(out_f32, ref, atol=1e-4, rtol=1e-4), "f32 mismatch vs reference"

    # Fast path (default): bf16 MXU operands with f32 accumulate.
    out_bf16 = jax.block_until_ready(ln_actor_forward(x, params))
    assert out_bf16.shape == (batch, action_dim)
    assert jnp.allclose(out_bf16, ref, atol=3e-2, rtol=3e-2), "bf16 mismatch vs reference"

    print("KERNEL_OK")
</pallas_src>

<mosaic_0001>
module attributes {stable_mosaic.version = 11 : i64} {
  func.func @_ln_actor_kernel(%arg0: i32, %arg1: memref<64x16xf32, #tpu.memory_space<vmem>>, %arg2: memref<16x128xf32, #tpu.memory_space<vmem>>, %arg3: memref<1x128xf32, #tpu.memory_space<vmem>>, %arg4: memref<1x128xf32, #tpu.memory_space<vmem>>, %arg5: memref<1x128xf32, #tpu.memory_space<vmem>>, %arg6: memref<128x128xf32, #tpu.memory_space<vmem>>, %arg7: memref<1x128xf32, #tpu.memory_space<vmem>>, %arg8: memref<1x128xf32, #tpu.memory_space<vmem>>, %arg9: memref<1x128xf32, #tpu.memory_space<vmem>>, %arg10: memref<128x8xf32, #tpu.memory_space<vmem>>, %arg11: memref<1x8xf32, #tpu.memory_space<vmem>>, %arg12: memref<64x8xf32, #tpu.memory_space<vmem>>) attributes {dimension_semantics = [#tpu.dimension_semantics<parallel>], iteration_bounds = array<i64: 2>, scalar_prefetch = 0 : i64, scratch_operands = 0 : i64, tpu.core_type = #tpu.core_type<tc>, window_params = [{transform_indices = @transform_0, window_bounds = array<i64: 64, 16>}, {pipeline_mode = #tpu.pipeline_mode<synchronous>, transform_indices = @transform_1, window_bounds = array<i64: 16, 128>}, {pipeline_mode = #tpu.pipeline_mode<synchronous>, transform_indices = @transform_2, window_bounds = array<i64: 1, 128>}, {pipeline_mode = #tpu.pipeline_mode<synchronous>, transform_indices = @transform_3, window_bounds = array<i64: 1, 128>}, {pipeline_mode = #tpu.pipeline_mode<synchronous>, transform_indices = @transform_4, window_bounds = array<i64: 1, 128>}, {pipeline_mode = #tpu.pipeline_mode<synchronous>, transform_indices = @transform_5, window_bounds = array<i64: 128, 128>}, {pipeline_mode = #tpu.pipeline_mode<synchronous>, transform_indices = @transform_6, window_bounds = array<i64: 1, 128>}, {pipeline_mode = #tpu.pipeline_mode<synchronous>, transform_indices = @transform_7, window_bounds = array<i64: 1, 128>}, {pipeline_mode = #tpu.pipeline_mode<synchronous>, transform_indices = @transform_8, window_bounds = array<i64: 1, 128>}, {pipeline_mode = #tpu.pipeline_mode<synchronous>, transform_indices = @transform_9, window_bounds = array<i64: 128, 8>}, {pipeline_mode = #tpu.pipeline_mode<synchronous>, transform_indices = @transform_10, window_bounds = array<i64: 1, 8>}, {transform_indices = @transform_11, window_bounds = array<i64: 64, 8>}]} {
    %c0 = arith.constant 0 : index
    %c0_0 = arith.constant 0 : index
    %0 = vector.load %arg1[%c0, %c0_0] : memref<64x16xf32, #tpu.memory_space<vmem>>, vector<64x16xf32>
    %c0_1 = arith.constant 0 : index
    %c0_2 = arith.constant 0 : index
    %1 = vector.load %arg2[%c0_1, %c0_2] : memref<16x128xf32, #tpu.memory_space<vmem>>, vector<16x128xf32>
    %cst = arith.constant dense<0.000000e+00> : vector<64x128xf32>
    %2 = tpu.matmul %0, %1, %cst {dimension_numbers = #tpu.dot_dimension_numbers<[1], [0], [0], [1], [0, 0, 1, 1], [], []>} : vector<64x16xf32>, vector<16x128xf32>, vector<64x128xf32> -> vector<64x128xf32>
    %c0_3 = arith.constant 0 : index
    %c0_4 = arith.constant 0 : index
    %3 = vector.load %arg3[%c0_3, %c0_4] : memref<1x128xf32, #tpu.memory_space<vmem>>, vector<1x128xf32>
    %4 = vector.broadcast %3 : vector<1x128xf32> to vector<64x128xf32>
    %5 = arith.addf %2, %4 : vector<64x128xf32>
    %cst_5 = arith.constant 0.000000e+00 : f32
    %6 = vector.broadcast %cst_5 : f32 to vector<64x128xf32>
    %7 = arith.maximumf %5, %6 : vector<64x128xf32>
    %c0_6 = arith.constant 0 : index
    %c0_7 = arith.constant 0 : index
    %8 = vector.load %arg4[%c0_6, %c0_7] : memref<1x128xf32, #tpu.memory_space<vmem>>, vector<1x128xf32>
    %c0_8 = arith.constant 0 : index
    %c0_9 = arith.constant 0 : index
    %9 = vector.load %arg5[%c0_8, %c0_9] : memref<1x128xf32, #tpu.memory_space<vmem>>, vector<1x128xf32>
    %cst_10 = arith.constant dense<0.000000e+00> : vector<64xf32>
    %10 = vector.multi_reduction <add>, %7, %cst_10 [1] : vector<64x128xf32> to vector<64xf32>
    %11 = vector.shape_cast %10 : vector<64xf32> to vector<64x1xf32>
    %cst_11 = arith.constant 3.125000e-02 : f32
    %12 = vector.broadcast %cst_11 : f32 to vector<64x1xf32>
    %13 = arith.mulf %11, %12 : vector<64x1xf32>
    %14 = arith.mulf %7, %7 : vector<64x128xf32>
    %cst_12 = arith.constant dense<0.000000e+00> : vector<64xf32>
    %15 = vector.multi_reduction <add>, %14, %cst_12 [1] : vector<64x128xf32> to vector<64xf32>
    %16 = vector.shape_cast %15 : vector<64xf32> to vector<64x1xf32>
    %cst_13 = arith.constant 3.125000e-02 : f32
    %17 = vector.broadcast %cst_13 : f32 to vector<64x1xf32>
    %18 = arith.mulf %16, %17 : vector<64x1xf32>
    %19 = arith.mulf %13, %13 : vector<64x1xf32>
    %20 = arith.subf %18, %19 : vector<64x1xf32>
    %cst_14 = arith.constant 9.99999974E-6 : f32
    %21 = vector.broadcast %cst_14 : f32 to vector<64x1xf32>
    %22 = arith.addf %20, %21 : vector<64x1xf32>
    %23 = math.rsqrt %22 : vector<64x1xf32>
    %24 = vector.broadcast %13 : vector<64x1xf32> to vector<64x128xf32>
    %25 = arith.subf %7, %24 : vector<64x128xf32>
    %26 = vector.broadcast %23 : vector<64x1xf32> to vector<64x128xf32>
    %27 = arith.mulf %25, %26 : vector<64x128xf32>
    %28 = vector.broadcast %8 : vector<1x128xf32> to vector<64x128xf32>
    %29 = arith.mulf %27, %28 : vector<64x128xf32>
    %30 = vector.broadcast %9 : vector<1x128xf32> to vector<64x128xf32>
    %31 = arith.addf %29, %30 : vector<64x128xf32>
    %c0_15 = arith.constant 0 : index
    %c0_16 = arith.constant 0 : index
    %32 = vector.load %arg6[%c0_15, %c0_16] : memref<128x128xf32, #tpu.memory_space<vmem>>, vector<128x128xf32>
    %cst_17 = arith.constant dense<0.000000e+00> : vector<64x128xf32>
    %33 = tpu.matmul %31, %32, %cst_17 {dimension_numbers = #tpu.dot_dimension_numbers<[1], [0], [0], [1], [0, 0, 1, 1], [], []>} : vector<64x128xf32>, vector<128x128xf32>, vector<64x128xf32> -> vector<64x128xf32>
    %c0_18 = arith.constant 0 : index
    %c0_19 = arith.constant 0 : index
    %34 = vector.load %arg7[%c0_18, %c0_19] : memref<1x128xf32, #tpu.memory_space<vmem>>, vector<1x128xf32>
    %35 = vector.broadcast %34 : vector<1x128xf32> to vector<64x128xf32>
    %36 = arith.addf %33, %35 : vector<64x128xf32>
    %cst_20 = arith.constant 0.000000e+00 : f32
    %37 = vector.broadcast %cst_20 : f32 to vector<64x128xf32>
    %38 = arith.maximumf %36, %37 : vector<64x128xf32>
    %c0_21 = arith.constant 0 : index
    %c0_22 = arith.constant 0 : index
    %39 = vector.load %arg8[%c0_21, %c0_22] : memref<1x128xf32, #tpu.memory_space<vmem>>, vector<1x128xf32>
    %c0_23 = arith.constant 0 : index
    %c0_24 = arith.constant 0 : index
    %40 = vector.load %arg9[%c0_23, %c0_24] : memref<1x128xf32, #tpu.memory_space<vmem>>, vector<1x128xf32>
    %cst_25 = arith.constant dense<0.000000e+00> : vector<64xf32>
    %41 = vector.multi_reduction <add>, %38, %cst_25 [1] : vector<64x128xf32> to vector<64xf32>
    %42 = vector.shape_cast %41 : vector<64xf32> to vector<64x1xf32>
    %cst_26 = arith.constant 3.125000e-02 : f32
    %43 = vector.broadcast %cst_26 : f32 to vector<64x1xf32>
    %44 = arith.mulf %42, %43 : vector<64x1xf32>
    %45 = arith.mulf %38, %38 : vector<64x128xf32>
    %cst_27 = arith.constant dense<0.000000e+00> : vector<64xf32>
    %46 = vector.multi_reduction <add>, %45, %cst_27 [1] : vector<64x128xf32> to vector<64xf32>
    %47 = vector.shape_cast %46 : vector<64xf32> to vector<64x1xf32>
    %cst_28 = arith.constant 3.125000e-02 : f32
    %48 = vector.broadcast %cst_28 : f32 to vector<64x1xf32>
    %49 = arith.mulf %47, %48 : vector<64x1xf32>
    %50 = arith.mulf %44, %44 : vector<64x1xf32>
    %51 = arith.subf %49, %50 : vector<64x1xf32>
    %cst_29 = arith.constant 9.99999974E-6 : f32
    %52 = vector.broadcast %cst_29 : f32 to vector<64x1xf32>
    %53 = arith.addf %51, %52 : vector<64x1xf32>
    %54 = math.rsqrt %53 : vector<64x1xf32>
    %55 = vector.broadcast %44 : vector<64x1xf32> to vector<64x128xf32>
    %56 = arith.subf %38, %55 : vector<64x128xf32>
    %57 = vector.broadcast %54 : vector<64x1xf32> to vector<64x128xf32>
    %58 = arith.mulf %56, %57 : vector<64x128xf32>
    %59 = vector.broadcast %39 : vector<1x128xf32> to vector<64x128xf32>
    %60 = arith.mulf %58, %59 : vector<64x128xf32>
    %61 = vector.broadcast %40 : vector<1x128xf32> to vector<64x128xf32>
    %62 = arith.addf %60, %61 : vector<64x128xf32>
    %c0_30 = arith.constant 0 : index
    %c0_31 = arith.constant 0 : index
    %63 = vector.load %arg10[%c0_30, %c0_31] : memref<128x8xf32, #tpu.memory_space<vmem>>, vector<128x8xf32>
    %cst_32 = arith.constant dense<0.000000e+00> : vector<64x8xf32>
    %64 = tpu.matmul %62, %63, %cst_32 {dimension_numbers = #tpu.dot_dimension_numbers<[1], [0], [0], [1], [0, 0, 1, 1], [], []>} : vector<64x128xf32>, vector<128x8xf32>, vector<64x8xf32> -> vector<64x8xf32>
    %c0_33 = arith.constant 0 : index
    %c0_34 = arith.constant 0 : index
    %65 = vector.load %arg11[%c0_33, %c0_34] : memref<1x8xf32, #tpu.memory_space<vmem>>, vector<1x8xf32>
    %66 = vector.broadcast %65 : vector<1x8xf32> to vector<64x8xf32>
    %67 = arith.addf %64, %66 : vector<64x8xf32>
    %68 = math.tanh %67 : vector<64x8xf32>
    %c0_35 = arith.constant 0 : index
    %c0_36 = arith.constant 0 : index
    %69 = vector.load %arg12[%c0_35, %c0_36] : memref<64x8xf32, #tpu.memory_space<vmem>>, vector<64x8xf32>
    tpu.vector_store %arg12[%c0_35, %c0_36], %68 {strides = array<i32>} : memref<64x8xf32, #tpu.memory_space<vmem>>, vector<64x8xf32>,
    return
  }
  func.func @transform_0(%arg0: i32) -> (i32, i32) {
    %c0_i32 = arith.constant 0 : i32
    %c0_i32_0 = arith.constant 0 : i32
    return %arg0, %c0_i32 : i32, i32
  }
  func.func @transform_1(%arg0: i32) -> (i32, i32) {
    %c0_i32 = arith.constant 0 : i32
    %c0_i32_0 = arith.constant 0 : i32
    %c0_i32_1 = arith.constant 0 : i32
    return %c0_i32, %c0_i32_0 : i32, i32
  }
  func.func @transform_2(%arg0: i32) -> (i32, i32) {
    %c0_i32 = arith.constant 0 : i32
    %c0_i32_0 = arith.constant 0 : i32
    %c0_i32_1 = arith.constant 0 : i32
    return %c0_i32, %c0_i32_0 : i32, i32
  }
  func.func @transform_3(%arg0: i32) -> (i32, i32) {
    %c0_i32 = arith.constant 0 : i32
    %c0_i32_0 = arith.constant 0 : i32
    %c0_i32_1 = arith.constant 0 : i32
    return %c0_i32, %c0_i32_0 : i32, i32
  }
  func.func @transform_4(%arg0: i32) -> (i32, i32) {
    %c0_i32 = arith.constant 0 : i32
    %c0_i32_0 = arith.constant 0 : i32
    %c0_i32_1 = arith.constant 0 : i32
    return %c0_i32, %c0_i32_0 : i32, i32
  }
  func.func @transform_5(%arg0: i32) -> (i32, i32) {
    %c0_i32 = arith.constant 0 : i32
    %c0_i32_0 = arith.constant 0 : i32
    %c0_i32_1 = arith.constant 0 : i32
    return %c0_i32, %c0_i32_0 : i32, i32
  }
  func.func @transform_6(%arg0: i32) -> (i32, i32) {
    %c0_i32 = arith.constant 0 : i32
    %c0_i32_0 = arith.constant 0 : i32
    %c0_i32_1 = arith.constant 0 : i32
    return %c0_i32, %c0_i32_0 : i32, i32
  }
  func.func @transform_7(%arg0: i32) -> (i32, i32) {
    %c0_i32 = arith.constant 0 : i32
    %c0_i32_0 = arith.constant 0 : i32
    %c0_i32_1 = arith.constant 0 : i32
    return %c0_i32, %c0_i32_0 : i32, i32
  }
  func.func @transform_8(%arg0: i32) -> (i32, i32) {
    %c0_i32 = arith.constant 0 : i32
    %c0_i32_0 = arith.constant 0 : i32
    %c0_i32_1 = arith.constant 0 : i32
    return %c0_i32, %c0_i32_0 : i32, i32
  }
  func.func @transform_9(%arg0: i32) -> (i32, i32) {
    %c0_i32 = arith.constant 0 : i32
    %c0_i32_0 = arith.constant 0 : i32
    %c0_i32_1 = arith.constant 0 : i32
    return %c0_i32, %c0_i32_0 : i32, i32
  }
  func.func @transform_10(%arg0: i32) -> (i32, i32) {
    %c0_i32 = arith.constant 0 : i32
    %c0_i32_0 = arith.constant 0 : i32
    %c0_i32_1 = arith.constant 0 : i32
    return %c0_i32, %c0_i32_0 : i32, i32
  }
  func.func @transform_11(%arg0: i32) -> (i32, i32) {
    %c0_i32 = arith.constant 0 : i32
    %c0_i32_0 = arith.constant 0 : i32
    return %arg0, %c0_i32 : i32, i32
  }
}

</mosaic_0001>

<bundles_post_ra>
// kernel: tpu_custom_call.1
= control target key start
LH: loop header
LB: loop body
LE: loop exit
PB: predicated region body
PF: predicated region fallthrough
CT: control target
= control target key end

     0   :  { %s1263_s17 = smov 0   ;;  %s1607_s0 = inlined_call_operand.vmem [shape: f32[128,16], index: 0, kind: input, shape index: {}]   ;;  %s1608_s1 = inlined_call_operand.vmem [shape: f32[16,128], index: 1, kind: input, shape index: {}]   ;;  %s1609_s2 = inlined_call_operand.vmem [shape: f32[1,128], index: 2, kind: input, shape index: {}]   ;;  %s1610_s3 = inlined_call_operand.vmem [shape: f32[1,128], index: 3, kind: input, shape index: {}]   ;;  %s1611_s4 = inlined_call_operand.vmem [shape: f32[1,128], index: 4, kind: input, shape index: {}]   ;;  %s1612_s5 = inlined_call_operand.vmem [shape: f32[128,128], index: 5, kind: input, shape index: {}]   ;;  %s1613_s6 = inlined_call_operand.vmem [shape: f32[1,128], index: 6, kind: input, shape index: {}]   ;;  %s1614_s7 = inlined_call_operand.vmem [shape: f32[1,128], index: 7, kind: input, shape index: {}]   ;;  %s1615_s8 = inlined_call_operand.vmem [shape: f32[1,128], index: 8, kind: input, shape index: {}]   ;;  %s1616_s9 = inlined_call_operand.vmem [shape: f32[128,8], index: 9, kind: input, shape index: {}]   ;;  %s1617_s10 = inlined_call_operand.vmem [shape: f32[1,8], index: 10, kind: input, shape index: {}]   ;;  %s1618_s11 = inlined_call_operand.vmem [shape: f32[128,8], index: 11, kind: output, shape index: {}]  }
   0x1 LB: > { %s1081_s18 = sadd.s32 4294967295, %s1201_s17   ;;  %p1085_p0 = scmp.ge.s32.totalorder %s1201_s17, 1  ;;  %s1201_s17 = sphi %s1263_s17, %s21_s17  }
   0x2   : > { %p338_p1 = scmp.lt.s32.totalorder %s1201_s17, 3 }
   0x4   : > { %p339_p2 = pnand %p1085_p0, %p338_p1 }
   0x5   : > { %s1086_s23 = sshll.u32 (!%p339_p2), %s1081_s18, 3 }
   0x6   : > { %342 = sbr.rel (%p339_p2) target bundleno = 784 (0x310), region = 64  ;;  %p379_p3 = scmp.lt.s32.totalorder (!%p339_p2), %s1086_s23, 15 }
   0xb   : > { %v399_v0 = vld [vmem:[%s1608_s1 + $0x8] sm:$0xff]  ;;  %v398_v1 = vld [vmem:[%s1608_s1] sm:$0xff]  ;;  %s1620_s23 = smov (!%p379_p3, %s1086_s23), 15  ;;  %vm404_vm0 = vcmask 130048   ;;  %v693_v43 = vld [vmem:[%s1612_s5 + $0x78] sm:$0xff] }
   0xc   : > { %443 = vmatpush.msra.mxu0 %v399_v0  ;;  %s1087_s24 = sshll.u32 %s1620_s23, 3  ;;  %v1140_v10 = vld [vmem:[%s1609_s2] ss:$0 sm:$0xff]  ;;  %698 = vmatpush.msra.mxu1 %v693_v43  ;;  %v692_v44 = vld [vmem:[%s1612_s5 + $0x70] sm:$0xff]  ;;  %v691_v45 = vld [vmem:[%s1612_s5 + $0x68] sm:$0xff] }
   0xd   : > { %s382_s27 = scalar_lea.vmem %s1607_s0, %s1087_s24  ;;  %1100 = vmatpush.msra.mxu3 %v693_v43  ;;  %v690_v46 = vld [vmem:[%s1612_s5 + $0x60] sm:$0xff]  ;;  %v689_v47 = vld [vmem:[%s1612_s5 + $0x58] sm:$0xff]  ;;  %v688_v48 = vld [vmem:[%s1612_s5 + $0x50] sm:$0xff]  ;;  %s1586_s28 = scalar_lea.vmem %s1618_s11, %s1087_s24 }
   0xe   : > { %444 = vmatpush.msra.mxu0 %v398_v1  ;;  %v390_v2 = vld [vmem:[%s382_s27] sm:$0xff]  ;;  %v391_v3 = vld [vmem:[%s382_s27 + $0x8] sm:$0xff]  ;;  %v392_v4 = vld [vmem:[%s382_s27 + $0x10] sm:$0xff]  ;;  %699 = vmatpush.msra.mxu1 %v692_v44 }
   0xf   : > { %1090 = vmatmul.msk.f32.vlgmr.msra.gmra.mxu0 %vm404_vm0, %v390_v2  ;;  %v393_v5 = vld [vmem:[%s382_s27 + $0x18] sm:$0xff]  ;;  %v394_v6 = vld [vmem:[%s382_s27 + $0x20] sm:$0xff]  ;;  %v395_v7 = vld [vmem:[%s382_s27 + $0x28] sm:$0xff]  ;;  %1101 = vmatpush.msra.mxu3 %v692_v44 }
  0x10   : > { %v396_v8 = vld [vmem:[%s382_s27 + $0x30] sm:$0xff]  ;;  %v397_v9 = vld [vmem:[%s382_s27 + $0x38] sm:$0xff]  ;;  %700 = vmatpush.msra.mxu1 %v691_v45  ;;  %v687_v49 = vld [vmem:[%s1612_s5 + $0x48] sm:$0xff] }
  0x11   : > { %1102 = vmatpush.msra.mxu3 %v691_v45  ;;  %v686_v50 = vld [vmem:[%s1612_s5 + $0x40] sm:$0xff]  ;;  %v685_v51 = vld [vmem:[%s1612_s5 + $0x38] sm:$0xff]  ;;  %v684_v52 = vld [vmem:[%s1612_s5 + $0x30] sm:$0xff] }
  0x12   : > { %701 = vmatpush.msra.mxu1 %v690_v46  ;;  %v683_v53 = vld [vmem:[%s1612_s5 + $0x28] sm:$0xff]  ;;  %v682_v54 = vld [vmem:[%s1612_s5 + $0x20] sm:$0xff]  ;;  %v681_v55 = vld [vmem:[%s1612_s5 + $0x18] sm:$0xff] }
  0x13   : > { %1103 = vmatpush.msra.mxu3 %v690_v46  ;;  %v680_v57 = vld [vmem:[%s1612_s5 + $0x10] sm:$0xff]  ;;  %v679_v58 = vld [vmem:[%s1612_s5 + $0x8] sm:$0xff]  ;;  %v678_v60 = vld [vmem:[%s1612_s5] sm:$0xff] }
  0x14   : > { %702 = vmatpush.msra.mxu1 %v689_v47 }
  0x15   : > { %1104 = vmatpush.msra.mxu3 %v689_v47 }
  0x16   : > { %703 = vmatpush.msra.mxu1 %v688_v48 }
  0x17   : > { %1091 = vmatmul.msk.f32.gmra.mxu0 %vm404_vm0, %v391_v3  ;;  %1105 = vmatpush.msra.mxu3 %v688_v48 }
  0x18   : > { %704 = vmatpush.msra.mxu1 %v687_v49 }
  0x19   : > { %1106 = vmatpush.msra.mxu3 %v687_v49 }
  0x1a   : > { %705 = vmatpush.msra.mxu1 %v686_v50 }
  0x1b   : > { %1107 = vmatpush.msra.mxu3 %v686_v50 }
  0x1c   : > { %706 = vmatpush.msra.mxu1 %v685_v51 }
  0x1d   : > { %1108 = vmatpush.msra.mxu3 %v685_v51 }
  0x1e   : > { %707 = vmatpush.msra.mxu1 %v684_v52 }
  0x1f   : > { %1092 = vmatmul.msk.f32.gmra.mxu0 %vm404_vm0, %v392_v4  ;;  %1109 = vmatpush.msra.mxu3 %v684_v52 }
  0x20   : > { %708 = vmatpush.msra.mxu1 %v683_v53 }
  0x21   : > { %1110 = vmatpush.msra.mxu3 %v683_v53 }
  0x22   : > { %709 = vmatpush.msra.mxu1 %v682_v54 }
  0x23   : > { %1111 = vmatpush.msra.mxu3 %v682_v54 }
  0x24   : > { %710 = vmatpush.msra.mxu1 %v681_v55 }
  0x25   : > { %1112 = vmatpush.msra.mxu3 %v681_v55 }
  0x26   : > { %711 = vmatpush.msra.mxu1 %v680_v57 }
  0x27   : > { %1093 = vmatmul.msk.f32.gmra.mxu0 %vm404_vm0, %v393_v5  ;;  %1113 = vmatpush.msra.mxu3 %v680_v57 }
  0x28   : > { %712 = vmatpush.msra.mxu1 %v679_v58 }
  0x29   : > { %1114 = vmatpush.msra.mxu3 %v679_v58 }
  0x2a   : > { %713 = vmatpush.msra.mxu1 %v678_v60 }
  0x2b   : > { %1115 = vmatpush.msra.mxu3 %v678_v60 }
  0x2f   : > { %1094 = vmatmul.msk.f32.gmra.mxu0 %vm404_vm0, %v394_v6 }
  0x37   : > { %1095 = vmatmul.msk.f32.gmra.mxu0 %vm404_vm0, %v395_v7 }
  0x3f   : > { %1096 = vmatmul.msk.f32.gmra.mxu0 %vm404_vm0, %v396_v8 }
  0x47   : > { %1097 = vmatmul.msk.f32.gmra.mxu0 %vm404_vm0, %v397_v9 }
  0x8c   : > { %v446_v11 = vpop.f32.mrf.mxu0 }
  0x8d   : > { %v447_v12 = vadd.f32 %v1140_v10, %v446_v11 }
  0x8f   : > { %v1296_v13 = vmax.f32 %v447_v12, 0.0 }
  0x91   : > { %480 = vadd.xlane.f32.xlu0 %v1296_v13  ;;  %v504_v17 = vmul.f32 %v1296_v13, %v1296_v13 }
  0x94   : > { %v449_v14 = vpop.f32.mrf.mxu0 }
  0x95   : > { %v450_v15 = vadd.f32 %v1140_v10, %v449_v14 }
  0x97   : > { %v1299_v16 = vmax.f32 %v450_v15, 0.0 }
  0x99   : > { %482 = vadd.xlane.f32.xlu1 %v1299_v16  ;;  %512 = vadd.xlane.f32.xlu0 %v504_v17  ;;  %v505_v21 = vmul.f32 %v1299_v16, %v1299_v16 }
  0x9c   : > { %v452_v18 = vpop.f32.mrf.mxu0 }
  0x9d   : > { %v453_v19 = vadd.f32 %v1140_v10, %v452_v18 }
  0x9f   : > { %v1304_v20 = vmax.f32 %v453_v19, 0.0 }
  0xa1   : > { %484 = vadd.xlane.f32.xlu2 %v1304_v20  ;;  %514 = vadd.xlane.f32.xlu1 %v505_v21  ;;  %v506_v25 = vmul.f32 %v1304_v20, %v1304_v20 }
  0xa4   : > { %v455_v22 = vpop.f32.mrf.mxu0 }
  0xa5   : > { %v456_v23 = vadd.f32 %v1140_v10, %v455_v22 }
  0xa7   : > { %v1309_v24 = vmax.f32 %v456_v23, 0.0 }
  0xa9   : > { %516 = vadd.xlane.f32.xlu2 %v506_v25  ;;  %486 = vadd.xlane.f32.xlu0 %v1309_v24  ;;  %v507_v27 = vmul.f32 %v1309_v24, %v1309_v24 }
  0xac   : > { %v458_v26 = vpop.f32.mrf.mxu0 }
  0xad   : > { %v459_v32 = vadd.f32 %v1140_v10, %v458_v26 }
  0xaf   : > { %v1321_v35 = vmax.f32 %v459_v32, 0.0  ;;  %v1394_v32 = vld [vmem:[%s1610_s3] ss:$0 sm:$0xff] }
  0xb1   : > { %518 = vadd.xlane.f32.xlu2 %v507_v27  ;;  %v508_v39 = vmul.f32 %v1321_v35, %v1321_v35 }
  0xb4   : > { %v461_v28 = vpop.f32.mrf.mxu0 }
  0xb5   : > { %v462_v38 = vadd.f32 %v1140_v10, %v461_v28 }
  0xb7   : > { %v1329_v40 = vmax.f32 %v462_v38, 0.0 }
  0xb9   : > { %v509_v42 = vmul.f32 %v1329_v40, %v1329_v40 }
  0xbc   : > { %v464_v29 = vpop.f32.mrf.mxu0 }
  0xbd   : > { %v465_v30 = vadd.f32 %v1140_v10, %v464_v29 }
  0xbf   : > { %v1316_v31 = vmax.f32 %v465_v30, 0.0 }
  0xc1   : > { %492 = vadd.xlane.f32.xlu1 %v1316_v31  ;;  %v510_v33 = vmul.f32 %v1316_v31, %v1316_v31 }
  0xc3   : > { %524 = vadd.xlane.f32.xlu0 %v510_v33 }
  0xc4   : > { %v467_v34 = vpop.f32.mrf.mxu0 }
  0xc5   : > { %v468_v36 = vadd.f32 %v1140_v10, %v467_v34 }
  0xc7   : > { %v1323_v37 = vmax.f32 %v468_v36, 0.0 }
  0xc9   : > { %494 = vadd.xlane.f32.xlu2 %v1323_v37  ;;  %488 = vadd.xlane.f32.xlu1 %v1321_v35  ;;  %v511_v41 = vmul.f32 %v1323_v37, %v1323_v37 }
  0xcb   : > { %520 = vadd.xlane.f32.xlu0 %v508_v39 }
  0xd1   : > { %490 = vadd.xlane.f32.xlu2 %v1329_v40  ;;  %526 = vadd.xlane.f32.xlu1 %v511_v41 }
  0xd3   : > { %522 = vadd.xlane.f32.xlu0 %v509_v42  ;;  %v1401_v42 = vld [vmem:[%s1611_s4] ss:$0 sm:$0xff] }
 0x104   : > { %v481_v56 = vpop.xlane.xlu0 %480 }
 0x105   : > { %v496_v59 = vmul.f32 0.03125, %v481_v56 }
 0x107   : > { %v536_v63 = vmul.f32 %v496_v59, %v496_v59  ;;  %v640_v30 = vsub.f32 %v1296_v13, %v496_v59 }
 0x10c   : > { %v483_v61 = vpop.xlane.xlu1 %482  ;;  %v513_v62 = vpop.xlane.xlu0 %512 }
 0x10d   : > { %v528_v0 = vmul.f32 0.03125, %v513_v62  ;;  %v497_v2 = vmul.f32 0.03125, %v483_v61 }
 0x10f   : > { %v544_v1 = vsub.f32 %v528_v0, %v536_v63  ;;  %v537_v6 = vmul.f32 %v497_v2, %v497_v2  ;;  %v641_v51 = vsub.f32 %v1299_v16, %v497_v2 }
 0x111   : > { %v552_v3 = vadd.f32 1e-05, %v544_v1 }
 0x113   : > { %1147 = vrsqrt.f32 %v552_v3  ;;  %vm566_vm2 = vweird.f32 %v552_v3 }
 0x114   : > { %v485_v4 = vpop.xlane.xlu2 %484  ;;  %v515_v5 = vpop.xlane.xlu1 %514 }
 0x115   : > { %v529_v7 = vmul.f32 0.03125, %v515_v5  ;;  %v1384_v10 = vmul.f32 0.03125, %v485_v4 }
 0x117   : > { %v545_v8 = vsub.f32 %v529_v7, %v537_v6  ;;  %v538_v17 = vmul.f32 %v1384_v10, %v1384_v10  ;;  %v642_v16 = vsub.f32 %v1304_v20, %v1384_v10 }
 0x119   : > { %v1148_v9 = vpop.eup %1147  ;;  %v553_v11 = vadd.f32 1e-05, %v545_v8 }
 0x11a   : > { %v561_v12 = vmul.f32 %v1148_v9, %v552_v3  ;;  %vm567_vm1 = vweird.f32 %v1148_v9 }
 0x11b   : > { %1149 = vrsqrt.f32 %v553_v11  ;;  %vm568_vm3 = vmor %vm566_vm2, %vm567_vm1  ;;  %vm576_vm5 = vweird.f32 %v553_v11 }
 0x11c   : > { %v562_v14 = vmul.f32 %v1148_v9, %v561_v12  ;;  %v517_v15 = vpop.xlane.xlu2 %516  ;;  %v487_v21 = vpop.xlane.xlu0 %486 }
 0x11d   : > { %v530_v18 = vmul.f32 0.03125, %v517_v15  ;;  %v1388_v27 = vmul.f32 0.03125, %v487_v21 }
 0x11e   : > { %v563_v19 = vmul.f32 0.5, %v562_v14 }
 0x11f   : > { %v546_v22 = vsub.f32 %v530_v18, %v538_v17  ;;  %v539_v38 = vmul.f32 %v1388_v27, %v1388_v27  ;;  %v643_v12 = vsub.f32 %v1309_v24, %v1388_v27 }
 0x120   : > { %v564_v23 = vsub.f32 1.5, %v563_v19 }
 0x121   : > { %v1150_v25 = vpop.eup %1149  ;;  %v554_v26 = vadd.f32 1e-05, %v546_v22 }
 0x122   : > { %v571_v28 = vmul.f32 %v1150_v25, %v553_v11  ;;  %v565_v29 = vmul.f32 %v1148_v9, %v564_v23  ;;  %vm577_vm4 = vweird.f32 %v1150_v25 }
 0x123   : > { %1151 = vrsqrt.f32 %v554_v26  ;;  %vm578_vm6 = vmor %vm576_vm5, %vm577_vm4  ;;  %vm586_vm8 = vweird.f32 %v554_v26 }
 0x124   : > { %v572_v33 = vmul.f32 %v1150_v25, %v571_v28  ;;  %v519_v34 = vpop.xlane.xlu2 %518  ;;  %v569_v36 = vsel %vm568_vm3, %v1148_v9, %v565_v29 }
 0x125   : > { %v531_v39 = vmul.f32 0.03125, %v519_v34  ;;  %v648_v41 = vmul.f32 %v640_v30, %v569_v36 }
 0x126   : > { %v573_v13 = vmul.f32 0.5, %v572_v33 }
 0x127   : > { %v547_v43 = vsub.f32 %v531_v39, %v539_v38  ;;  %v659_v44 = vmul.f32 %v1394_v32, %v648_v41 }
 0x128   : > { %v574_v45 = vsub.f32 1.5, %v573_v13 }
 0x129   : > { %v1152_v46 = vpop.eup %1151  ;;  %v555_v47 = vadd.f32 1e-05, %v547_v43  ;;  %v670_v48 = vadd.f32 %v1401_v42, %v659_v44 }
 0x12a   : > { %v581_v49 = vmul.f32 %v1152_v46, %v554_v26  ;;  %v575_v50 = vmul.f32 %v1150_v25, %v574_v45  ;;  %vm587_vm7 = vweird.f32 %v1152_v46 }
 0x12b   : > { %1153 = vrsqrt.f32 %v555_v47  ;;  %714 = vmatmul.f32.vlgmr.msra.gmra.mxu1 %v670_v48  ;;  %vm588_vm9 = vmor %vm586_vm8, %vm587_vm7  ;;  %vm596_vm11 = vweird.f32 %v555_v47 }
 0x12c   : > { %v582_v52 = vmul.f32 %v1152_v46, %v581_v49  ;;  %v579_v53 = vsel %vm578_vm6, %v1150_v25, %v575_v50 }
 0x12d   : > { %v649_v54 = vmul.f32 %v641_v51, %v579_v53 }
 0x12e   : > { %v583_v55 = vmul.f32 0.5, %v582_v52 }
 0x12f   : > { %v660_v56 = vmul.f32 %v1394_v32, %v649_v54 }
 0x130   : > { %v584_v57 = vsub.f32 1.5, %v583_v55 }
 0x131   : > { %v1154_v58 = vpop.eup %1153  ;;  %v671_v59 = vadd.f32 %v1401_v42, %v660_v56 }
 0x132   : > { %v591_v60 = vmul.f32 %v1154_v58, %v555_v47  ;;  %v585_v61 = vmul.f32 %v1152_v46, %v584_v57  ;;  %vm597_vm10 = vweird.f32 %v1154_v58 }
 0x133   : > { %717 = vmatmul.f32.gmra.mxu1 %v671_v59  ;;  %vm598_vm12 = vmor %vm596_vm11, %vm597_vm10 }
 0x134   : > { %v592_v62 = vmul.f32 %v1154_v58, %v591_v60  ;;  %v493_v63 = vpop.xlane.xlu1 %492  ;;  %v589_v0 = vsel %vm588_vm9, %v1152_v46, %v585_v61 }
 0x135   : > { %v502_v1 = vmul.f32 0.03125, %v493_v63  ;;  %v650_v2 = vmul.f32 %v642_v16, %v589_v0 }
 0x136   : > { %v593_v3 = vmul.f32 0.5, %v592_v62  ;;  %v525_v4 = vpop.xlane.xlu0 %524 }
 0x137   : > { %v542_v5 = vmul.f32 %v502_v1, %v502_v1  ;;  %v534_v6 = vmul.f32 0.03125, %v525_v4  ;;  %v661_v7 = vmul.f32 %v1394_v32, %v650_v2  ;;  %v646_v53 = vsub.f32 %v1316_v31, %v502_v1 }
 0x138   : > { %v594_v8 = vsub.f32 1.5, %v593_v3 }
 0x139   : > { %v550_v9 = vsub.f32 %v534_v6, %v542_v5  ;;  %v672_v11 = vadd.f32 %v1401_v42, %v661_v7 }
 0x13a   : > { %v595_v20 = vmul.f32 %v1154_v58, %v594_v8 }
 0x13b   : > { %v558_v10 = vadd.f32 1e-05, %v550_v9  ;;  %720 = vmatmul.f32.gmra.mxu1 %v672_v11 }
 0x13c   : > { %v495_v14 = vpop.xlane.xlu2 %494  ;;  %v489_v15 = vpop.xlane.xlu1 %488  ;;  %v599_v17 = vsel %vm598_vm12, %v1154_v58, %v595_v20 }
 0x13d   : > { %1155 = vrsqrt.f32 %v558_v10  ;;  %v1414_v18 = vmul.f32 0.03125, %v489_v15  ;;  %v651_v21 = vmul.f32 %v643_v12, %v599_v17  ;;  %v1419_v26 = vmul.f32 0.03125, %v495_v14 }
 0x13e   : > { %v521_v19 = vpop.xlane.xlu0 %520  ;;  %vm626_vm14 = vweird.f32 %v558_v10 }
 0x13f   : > { %v540_v22 = vmul.f32 %v1414_v18, %v1414_v18  ;;  %v532_v23 = vmul.f32 0.03125, %v521_v19  ;;  %v662_v25 = vmul.f32 %v1394_v32, %v651_v21  ;;  %v543_v36 = vmul.f32 %v1419_v26, %v1419_v26 }
 0x140   : > { %v644_v1 = vsub.f32 %v1321_v35, %v1414_v18 }
 0x141   : > { %v548_v28 = vsub.f32 %v532_v23, %v540_v22  ;;  %v673_v29 = vadd.f32 %v1401_v42, %v662_v25  ;;  %v1143_v25 = vld [vmem:[%s1613_s6] ss:$0 sm:$0xff] }
 0x143   : > { %v1156_v24 = vpop.eup %1155  ;;  %v556_v30 = vadd.f32 1e-05, %v548_v28  ;;  %723 = vmatmul.f32.gmra.mxu1 %v673_v29 }
 0x144   : > { %v621_v27 = vmul.f32 %v1156_v24, %v558_v10  ;;  %v491_v33 = vpop.xlane.xlu2 %490  ;;  %v527_v34 = vpop.xlane.xlu1 %526  ;;  %vm627_vm13 = vweird.f32 %v1156_v24  ;;  %v647_v10 = vsub.f32 %v1323_v37, %v1419_v26 }
 0x145   : > { %v1424_v38 = vmul.f32 0.03125, %v491_v33  ;;  %v535_v39 = vmul.f32 0.03125, %v527_v34  ;;  %1157 = vrsqrt.f32 %v556_v30  ;;  %vm628_vm15 = vmor %vm626_vm14, %vm627_vm13  ;;  %vm606_vm1 = vweird.f32 %v556_v30 }
 0x146   : > { %v622_v41 = vmul.f32 %v1156_v24, %v621_v27  ;;  %v523_v13 = vpop.xlane.xlu0 %522 }
 0x147   : > { %v541_v43 = vmul.f32 %v1424_v38, %v1424_v38  ;;  %v551_v44 = vsub.f32 %v535_v39, %v543_v36  ;;  %v533_v45 = vmul.f32 0.03125, %v523_v13  ;;  %v645_v15 = vsub.f32 %v1329_v40, %v1424_v38 }
 0x148   : > { %v623_v46 = vmul.f32 0.5, %v622_v41 }
 0x149   : > { %v559_v47 = vadd.f32 1e-05, %v551_v44  ;;  %v549_v48 = vsub.f32 %v533_v45, %v541_v43 }
 0x14a   : > { %v624_v49 = vsub.f32 1.5, %v623_v46 }
 0x14b   : > { %1159 = vrsqrt.f32 %v559_v47  ;;  %v557_v50 = vadd.f32 1e-05, %v549_v48  ;;  %v1158_v51 = vpop.eup %1157  ;;  %vm636_vm4 = vweird.f32 %v559_v47 }
 0x14c   : > { %v625_v52 = vmul.f32 %v1156_v24, %v624_v49  ;;  %v601_v54 = vmul.f32 %v1158_v51, %v556_v30  ;;  %vm607_vm0 = vweird.f32 %v1158_v51 }
 0x14d   : > { %1161 = vrsqrt.f32 %v557_v50  ;;  %vm608_vm2 = vmor %vm606_vm1, %vm607_vm0  ;;  %vm616_vm7 = vweird.f32 %v557_v50 }
 0x14e   : > { %v629_v55 = vsel %vm628_vm15, %v1156_v24, %v625_v52  ;;  %v602_v56 = vmul.f32 %v1158_v51, %v601_v54 }
 0x14f   : > { %v654_v57 = vmul.f32 %v646_v53, %v629_v55 }
 0x150   : > { %v603_v59 = vmul.f32 0.5, %v602_v56 }
 0x151   : > { %v1160_v58 = vpop.eup %1159  ;;  %v665_v60 = vmul.f32 %v1394_v32, %v654_v57 }
 0x152   : > { %v631_v61 = vmul.f32 %v1160_v58, %v559_v47  ;;  %v604_v62 = vsub.f32 1.5, %v603_v59  ;;  %vm637_vm3 = vweird.f32 %v1160_v58  ;;  %v962_v59 = vld [vmem:[%s1616_s9 + $0x78] sm:$0xff] }
 0x153   : > { %v1162_v16 = vpop.eup %1161  ;;  %v676_v63 = vadd.f32 %v1401_v42, %v665_v60  ;;  %vm638_vm6 = vmor %vm636_vm4, %vm637_vm3  ;;  %967 = vmatpush.msra.mxu2 %v962_v59  ;;  %1116 = vmatpush.msrb.mxu3 %v962_v59  ;;  %v961_v60 = vld [vmem:[%s1616_s9 + $0x70] sm:$0xff] }
 0x154   : > { %v632_v0 = vmul.f32 %v1160_v58, %v631_v61  ;;  %v611_v2 = vmul.f32 %v1162_v16, %v557_v50  ;;  %v605_v31 = vmul.f32 %v1158_v51, %v604_v62  ;;  %vm617_vm5 = vweird.f32 %v1162_v16  ;;  %v960_v61 = vld [vmem:[%s1616_s9 + $0x68] sm:$0xff]  ;;  %v958_v62 = vld [vmem:[%s1616_s9 + $0x58] sm:$0xff] }
 0x155   : > { %732 = vmatmul.f32.vlgmr.msra.gmra.mxu3 %v676_v63  ;;  %vm618_vm8 = vmor %vm616_vm7, %vm617_vm5  ;;  %968 = vmatpush.msra.mxu2 %v961_v60  ;;  %v957_v63 = vld [vmem:[%s1616_s9 + $0x50] sm:$0xff] }
 0x156   : > { %v633_v3 = vmul.f32 0.5, %v632_v0  ;;  %v612_v4 = vmul.f32 %v1162_v16, %v611_v2  ;;  %v609_v5 = vsel %vm608_vm2, %v1158_v51, %v605_v31  ;;  %1117 = vmatpush.msrb.mxu3 %v961_v60  ;;  %v956_v0 = vld [vmem:[%s1616_s9 + $0x48] sm:$0xff]  ;;  %v955_v2 = vld [vmem:[%s1616_s9 + $0x40] sm:$0xff]  ;;  %v954_v31 = vld [vmem:[%s1616_s9 + $0x38] sm:$0xff] }
 0x157   : > { %v652_v8 = vmul.f32 %v644_v1, %v609_v5  ;;  %969 = vmatpush.msra.mxu2 %v960_v61  ;;  %v953_v1 = vld [vmem:[%s1616_s9 + $0x30] sm:$0xff]  ;;  %v950_v5 = vld [vmem:[%s1616_s9 + $0x18] sm:$0xff] }
 0x158   : > { %v634_v6 = vsub.f32 1.5, %v633_v3  ;;  %v613_v7 = vmul.f32 0.5, %v612_v4  ;;  %1118 = vmatpush.msrb.mxu3 %v960_v61  ;;  %v952_v3 = vld [vmem:[%s1616_s9 + $0x28] sm:$0xff]  ;;  %v951_v4 = vld [vmem:[%s1616_s9 + $0x20] sm:$0xff] }
 0x159   : > { %v663_v11 = vmul.f32 %v1394_v32, %v652_v8 }
 0x15a   : > { %v614_v9 = vsub.f32 1.5, %v613_v7  ;;  %v635_v20 = vmul.f32 %v1160_v58, %v634_v6  ;;  %v949_v6 = vld [vmem:[%s1616_s9 + $0x10] sm:$0xff]  ;;  %v948_v7 = vld [vmem:[%s1616_s9 + $0x8] sm:$0xff] }
 0x15b   : > { %v674_v35 = vadd.f32 %v1401_v42, %v663_v11 }
 0x15c   : > { %v639_v12 = vsel %vm638_vm6, %v1160_v58, %v635_v20  ;;  %v615_v14 = vmul.f32 %v1162_v16, %v614_v9  ;;  %v947_v9 = vld [vmem:[%s1616_s9] sm:$0xff] }
 0x15d   : > { %v655_v17 = vmul.f32 %v647_v10, %v639_v12  ;;  %726 = vmatmul.f32.gmra.mxu1 %v674_v35 }
 0x15e   : > { %v619_v18 = vsel %vm618_vm8, %v1162_v16, %v615_v14  ;;  %v959_v16 = vld [vmem:[%s1616_s9 + $0x60] sm:$0xff] }
 0x15f   : > { %v666_v19 = vmul.f32 %v1394_v32, %v655_v17  ;;  %v653_v21 = vmul.f32 %v645_v15, %v619_v18  ;;  %970 = vmatpush.msra.mxu2 %v959_v16  ;;  %1119 = vmatpush.msrb.mxu3 %v959_v16 }
 0x161   : > { %v677_v22 = vadd.f32 %v1401_v42, %v666_v19  ;;  %v664_v37 = vmul.f32 %v1394_v32, %v653_v21  ;;  %971 = vmatpush.msra.mxu2 %v958_v62  ;;  %1120 = vmatpush.msrb.mxu3 %v958_v62 }
 0x163   : > { %735 = vmatmul.f32.gmra.mxu3 %v677_v22  ;;  %v675_v23 = vadd.f32 %v1401_v42, %v664_v37  ;;  %972 = vmatpush.msra.mxu2 %v957_v63 }
 0x164   : > { %1121 = vmatpush.msrb.mxu3 %v957_v63 }
 0x165   : > { %729 = vmatmul.f32.gmra.mxu1 %v675_v23  ;;  %973 = vmatpush.msra.mxu2 %v956_v0 }
 0x166   : > { %1122 = vmatpush.msrb.mxu3 %v956_v0 }
 0x167   : > { %974 = vmatpush.msra.mxu2 %v955_v2 }
 0x168   : > { %1123 = vmatpush.msrb.mxu3 %v955_v2 }
 0x169   : > { %975 = vmatpush.msra.mxu2 %v954_v31 }
 0x16a   : > { %1124 = vmatpush.msrb.mxu3 %v954_v31 }
 0x16b   : > { %976 = vmatpush.msra.mxu2 %v953_v1 }
 0x16c   : > { %1125 = vmatpush.msrb.mxu3 %v953_v1 }
 0x16d   : > { %977 = vmatpush.msra.mxu2 %v952_v3 }
 0x16e   : > { %1126 = vmatpush.msrb.mxu3 %v952_v3 }
 0x16f   : > { %978 = vmatpush.msra.mxu2 %v951_v4 }
 0x170   : > { %1127 = vmatpush.msrb.mxu3 %v951_v4 }
 0x171   : > { %979 = vmatpush.msra.mxu2 %v950_v5 }
 0x172   : > { %1128 = vmatpush.msrb.mxu3 %v950_v5 }
 0x173   : > { %980 = vmatpush.msra.mxu2 %v949_v6 }
 0x174   : > { %1129 = vmatpush.msrb.mxu3 %v949_v6 }
 0x175   : > { %981 = vmatpush.msra.mxu2 %v948_v7 }
 0x176   : > { %1130 = vmatpush.msrb.mxu3 %v948_v7 }
 0x177   : > { %982 = vmatpush.msra.mxu2 %v947_v9 }
 0x178   : > { %1131 = vmatpush.msrb.mxu3 %v947_v9 }
 0x1a8   : > { %v715_v40 = vpop.f32.mrf.mxu1 }
 0x1a9   : > { %v716_v26 = vadd.f32 %v1143_v25, %v715_v40 }
 0x1ab   : > { %v1446_v28 = vmax.f32 %v716_v26, 0.0 }
 0x1ad   : > { %749 = vadd.xlane.f32.xlu1 %v1446_v28  ;;  %v773_v29 = vmul.f32 %v1446_v28, %v1446_v28 }
 0x1af   : > { %781 = vadd.xlane.f32.xlu2 %v773_v29 }
 0x1b0   : > { %v718_v24 = vpop.f32.mrf.mxu1 }
 0x1b1   : > { %v719_v32 = vadd.f32 %v1143_v25, %v718_v24 }
 0x1b3   : > { %v1451_v27 = vmax.f32 %v719_v32, 0.0 }
 0x1b5   : > { %751 = vadd.xlane.f32.xlu0 %v1451_v27  ;;  %v774_v42 = vmul.f32 %v1451_v27, %v1451_v27 }
 0x1b7   : > { %783 = vadd.xlane.f32.xlu1 %v774_v42 }
 0x1b8   : > { %v721_v30 = vpop.f32.mrf.mxu1 }
 0x1b9   : > { %v722_v33 = vadd.f32 %v1143_v25, %v721_v30 }
 0x1bb   : > { %v1456_v34 = vmax.f32 %v722_v33, 0.0 }
 0x1bd   : > { %753 = vadd.xlane.f32.xlu2 %v1456_v34  ;;  %v775_v36 = vmul.f32 %v1456_v34, %v1456_v34 }
 0x1bf   : > { %785 = vadd.xlane.f32.xlu0 %v775_v36 }
 0x1c0   : > { %v724_v38 = vpop.f32.mrf.mxu1 }
 0x1c1   : > { %v725_v39 = vadd.f32 %v1143_v25, %v724_v38 }
 0x1c3   : > { %v1461_v41 = vmax.f32 %v725_v39, 0.0 }
 0x1c5   : > { %755 = vadd.xlane.f32.xlu1 %v1461_v41  ;;  %v776_v13 = vmul.f32 %v1461_v41, %v1461_v41 }
 0x1c7   : > { %787 = vadd.xlane.f32.xlu2 %v776_v13 }
 0x1d8   : > { %v733_v43 = vpop.f32.mrf.mxu3 }
 0x1d9   : > { %v734_v44 = vadd.f32 %v1143_v25, %v733_v43 }
 0x1da   : > { %v727_v46 = vpop.f32.mrf.mxu1 }
 0x1db   : > { %v1466_v45 = vmax.f32 %v734_v44, 0.0  ;;  %v728_v47 = vadd.f32 %v1143_v25, %v727_v46 }
 0x1dd   : > { %761 = vadd.xlane.f32.xlu1 %v1466_v45  ;;  %v1469_v48 = vmax.f32 %v728_v47, 0.0  ;;  %v779_v54 = vmul.f32 %v1466_v45, %v1466_v45  ;;  %v1538_v47 = vld [vmem:[%s1614_s7] ss:$0 sm:$0xff] }
 0x1df   : > { %757 = vadd.xlane.f32.xlu0 %v1469_v48  ;;  %v777_v49 = vmul.f32 %v1469_v48, %v1469_v48 }
 0x1e1   : > { %789 = vadd.xlane.f32.xlu2 %v777_v49 }
 0x1e2   : > { %v730_v50 = vpop.f32.mrf.mxu1 }
 0x1e3   : > { %v731_v51 = vadd.f32 %v1143_v25, %v730_v50 }
 0x1e5   : > { %v1474_v52 = vmax.f32 %v731_v51, 0.0 }
 0x1e6   : > { %v736_v53 = vpop.f32.mrf.mxu3 }
 0x1e7   : > { %v737_v55 = vadd.f32 %v1143_v25, %v736_v53  ;;  %793 = vadd.xlane.f32.xlu0 %v779_v54  ;;  %759 = vadd.xlane.f32.xlu1 %v1474_v52  ;;  %v778_v58 = vmul.f32 %v1474_v52, %v1474_v52 }
 0x1e9   : > { %v1479_v56 = vmax.f32 %v737_v55, 0.0  ;;  %v1543_v55 = vld [vmem:[%s1615_s8] ss:$0 sm:$0xff] }
 0x1eb   : > { %763 = vadd.xlane.f32.xlu2 %v1479_v56  ;;  %v780_v57 = vmul.f32 %v1479_v56, %v1479_v56 }
 0x1ef   : > { %795 = vadd.xlane.f32.xlu1 %v780_v57  ;;  %791 = vadd.xlane.f32.xlu0 %v778_v58 }
 0x220   : > { %v750_v8 = vpop.xlane.xlu1 %749 }
 0x221   : > { %v765_v11 = vmul.f32 0.03125, %v750_v8 }
 0x222   : > { %v782_v20 = vpop.xlane.xlu2 %781 }
 0x223   : > { %v805_v10 = vmul.f32 %v765_v11, %v765_v11  ;;  %v797_v35 = vmul.f32 0.03125, %v782_v20  ;;  %v909_v44 = vsub.f32 %v1446_v28, %v765_v11 }
 0x225   : > { %v813_v12 = vsub.f32 %v797_v35, %v805_v10 }
 0x227   : > { %v821_v14 = vadd.f32 1e-05, %v813_v12 }
 0x228   : > { %v752_v15 = vpop.xlane.xlu0 %751 }
 0x229   : > { %1163 = vrsqrt.f32 %v821_v14  ;;  %v766_v17 = vmul.f32 0.03125, %v752_v15  ;;  %vm835_vm10 = vweird.f32 %v821_v14 }
 0x22a   : > { %v784_v18 = vpop.xlane.xlu1 %783 }
 0x22b   : > { %v806_v19 = vmul.f32 %v766_v17, %v766_v17  ;;  %v798_v21 = vmul.f32 0.03125, %v784_v18  ;;  %v910_v31 = vsub.f32 %v1451_v27, %v766_v17 }
 0x22d   : > { %v814_v22 = vsub.f32 %v798_v21, %v806_v19 }
 0x22f   : > { %v1164_v37 = vpop.eup %1163  ;;  %v822_v23 = vadd.f32 1e-05, %v814_v22 }
 0x230   : > { %v830_v25 = vmul.f32 %v1164_v37, %v821_v14  ;;  %v754_v40 = vpop.xlane.xlu2 %753  ;;  %vm836_vm9 = vweird.f32 %v1164_v37 }
 0x231   : > { %1165 = vrsqrt.f32 %v822_v23  ;;  %v767_v26 = vmul.f32 0.03125, %v754_v40  ;;  %vm837_vm11 = vmor %vm835_vm10, %vm836_vm9  ;;  %vm845_vm13 = vweird.f32 %v822_v23 }
 0x232   : > { %v831_v29 = vmul.f32 %v1164_v37, %v830_v25  ;;  %v786_v24 = vpop.xlane.xlu0 %785 }
 0x233   : > { %v807_v32 = vmul.f32 %v767_v26, %v767_v26  ;;  %v799_v42 = vmul.f32 0.03125, %v786_v24  ;;  %v911_v20 = vsub.f32 %v1456_v34, %v767_v26 }
 0x234   : > { %v832_v30 = vmul.f32 0.5, %v831_v29 }
 0x235   : > { %v815_v33 = vsub.f32 %v799_v42, %v807_v32 }
 0x236   : > { %v833_v36 = vsub.f32 1.5, %v832_v30 }
 0x237   : > { %v1166_v38 = vpop.eup %1165  ;;  %v823_v39 = vadd.f32 1e-05, %v815_v33 }
 0x238   : > { %v840_v13 = vmul.f32 %v1166_v38, %v822_v23  ;;  %v834_v43 = vmul.f32 %v1164_v37, %v833_v36  ;;  %v756_v46 = vpop.xlane.xlu1 %755  ;;  %vm846_vm12 = vweird.f32 %v1166_v38 }
 0x239   : > { %1167 = vrsqrt.f32 %v823_v39  ;;  %v768_v50 = vmul.f32 0.03125, %v756_v46  ;;  %vm847_vm14 = vmor %vm845_vm13, %vm846_vm12  ;;  %vm855_vm0 = vweird.f32 %v823_v39 }
 0x23a   : > { %v841_v49 = vmul.f32 %v1166_v38, %v840_v13  ;;  %v838_v51 = vsel %vm837_vm11, %v1164_v37, %v834_v43  ;;  %v788_v53 = vpop.xlane.xlu2 %787 }
 0x23b   : > { %v917_v54 = vmul.f32 %v909_v44, %v838_v51  ;;  %v808_v28 = vmul.f32 %v768_v50, %v768_v50  ;;  %v800_v58 = vmul.f32 0.03125, %v788_v53  ;;  %v912_v21 = vsub.f32 %v1461_v41, %v768_v50 }
 0x23c   : > { %v842_v57 = vmul.f32 0.5, %v841_v49 }
 0x23d   : > { %v928_v59 = vmul.f32 %v1538_v47, %v917_v54  ;;  %v816_v61 = vsub.f32 %v800_v58, %v808_v28 }
 0x23e   : > { %v843_v60 = vsub.f32 1.5, %v842_v57 }
 0x23f   : > { %v1168_v16 = vpop.eup %1167  ;;  %v939_v62 = vadd.f32 %v1543_v55, %v928_v59  ;;  %v824_v0 = vadd.f32 1e-05, %v816_v61 }
 0x240   : > { %v850_v63 = vmul.f32 %v1168_v16, %v823_v39  ;;  %v844_v2 = vmul.f32 %v1166_v38, %v843_v60  ;;  %vm856_vm15 = vweird.f32 %v1168_v16 }
 0x241   : > { %983 = vmatmul.f32.vlgmr.msra.gmra.mxu2 %v939_v62  ;;  %1169 = vrsqrt.f32 %v824_v0  ;;  %vm857_vm1 = vmor %vm855_vm0, %vm856_vm15  ;;  %vm865_vm3 = vweird.f32 %v824_v0 }
 0x242   : > { %v851_v1 = vmul.f32 %v1168_v16, %v850_v63  ;;  %v848_v3 = vsel %vm847_vm14, %v1166_v38, %v844_v2 }
 0x243   : > { %v918_v4 = vmul.f32 %v910_v31, %v848_v3 }
 0x244   : > { %v852_v5 = vmul.f32 0.5, %v851_v1 }
 0x245   : > { %v929_v6 = vmul.f32 %v1538_v47, %v918_v4 }
 0x246   : > { %v853_v7 = vsub.f32 1.5, %v852_v5 }
 0x247   : > { %v940_v8 = vadd.f32 %v1543_v55, %v929_v6  ;;  %v1170_v9 = vpop.eup %1169 }
 0x248   : > { %v854_v11 = vmul.f32 %v1168_v16, %v853_v7  ;;  %v860_v27 = vmul.f32 %v1170_v9, %v824_v0  ;;  %vm866_vm2 = vweird.f32 %v1170_v9 }
 0x249   : > { %986 = vmatmul.f32.gmra.mxu2 %v940_v8  ;;  %vm867_vm4 = vmor %vm865_vm3, %vm866_vm2 }
 0x24a   : > { %v858_v10 = vsel %vm857_vm1, %v1168_v16, %v854_v11  ;;  %v861_v35 = vmul.f32 %v1170_v9, %v860_v27  ;;  %vm1016_vm1 = vcmask 64512  }
 0x24b   : > { %v919_v12 = vmul.f32 %v911_v20, %v858_v10 }
 0x24c   : > { %v862_v14 = vmul.f32 0.5, %v861_v35 }
 0x24d   : > { %v930_v15 = vmul.f32 %v1538_v47, %v919_v12 }
 0x24e   : > { %v863_v17 = vsub.f32 1.5, %v862_v14 }
 0x24f   : > { %v941_v18 = vadd.f32 %v1543_v55, %v930_v15 }
 0x250   : > { %v864_v19 = vmul.f32 %v1170_v9, %v863_v17  ;;  %v762_v34 = vpop.xlane.xlu1 %761 }
 0x251   : > { %989 = vmatmul.f32.gmra.mxu2 %v941_v18  ;;  %v771_v32 = vmul.f32 0.03125, %v762_v34 }
 0x252   : > { %v758_v22 = vpop.xlane.xlu0 %757  ;;  %v868_v37 = vsel %vm867_vm4, %v1170_v9, %v864_v19 }
 0x253   : > { %v769_v23 = vmul.f32 0.03125, %v758_v22  ;;  %v920_v25 = vmul.f32 %v912_v21, %v868_v37  ;;  %v811_v41 = vmul.f32 %v771_v32, %v771_v32  ;;  %v915_v12 = vsub.f32 %v1466_v45, %v771_v32 }
 0x254   : > { %v790_v40 = vpop.xlane.xlu2 %789 }
 0x255   : > { %v809_v26 = vmul.f32 %v769_v23, %v769_v23  ;;  %v801_v29 = vmul.f32 0.03125, %v790_v40  ;;  %v931_v24 = vmul.f32 %v1538_v47, %v920_v25  ;;  %v913_v5 = vsub.f32 %v1469_v48, %v769_v23 }
 0x257   : > { %v817_v42 = vsub.f32 %v801_v29, %v809_v26  ;;  %v942_v30 = vadd.f32 %v1543_v55, %v931_v24 }
 0x259   : > { %v825_v33 = vadd.f32 1e-05, %v817_v42  ;;  %992 = vmatmul.f32.gmra.mxu2 %v942_v30 }
 0x25a   : > { %v760_v36 = vpop.xlane.xlu1 %759  ;;  %v794_v38 = vpop.xlane.xlu0 %793 }
 0x25b   : > { %1171 = vrsqrt.f32 %v825_v33  ;;  %v803_v39 = vmul.f32 0.03125, %v794_v38  ;;  %v1556_v44 = vmul.f32 0.03125, %v760_v36  ;;  %vm875_vm6 = vweird.f32 %v825_v33 }
 0x25d   : > { %v819_v13 = vsub.f32 %v803_v39, %v811_v41  ;;  %v810_v57 = vmul.f32 %v1556_v44, %v1556_v44  ;;  %v914_v29 = vsub.f32 %v1474_v52, %v1556_v44  ;;  %v1146_v52 = vld [vmem:[%s1617_s10] ss:$0 sm:$0xff] }
 0x25e   : > { %v764_v43 = vpop.xlane.xlu2 %763 }
 0x25f   : > { %v827_v46 = vadd.f32 1e-05, %v819_v13  ;;  %v1558_v49 = vmul.f32 0.03125, %v764_v43 }
 0x261   : > { %v1172_v50 = vpop.eup %1171  ;;  %1173 = vrsqrt.f32 %v827_v46  ;;  %v812_v28 = vmul.f32 %v1558_v49, %v1558_v49  ;;  %vm895_vm9 = vweird.f32 %v827_v46  ;;  %v916_v40 = vsub.f32 %v1479_v56, %v1558_v49 }
 0x262   : > { %v870_v51 = vmul.f32 %v1172_v50, %v825_v33  ;;  %v796_v53 = vpop.xlane.xlu1 %795  ;;  %v792_v54 = vpop.xlane.xlu0 %791  ;;  %vm876_vm5 = vweird.f32 %v1172_v50 }
 0x263   : > { %v804_v58 = vmul.f32 0.03125, %v796_v53  ;;  %v802_v59 = vmul.f32 0.03125, %v792_v54  ;;  %vm877_vm7 = vmor %vm875_vm6, %vm876_vm5 }
 0x264   : > { %v871_v60 = vmul.f32 %v1172_v50, %v870_v51 }
 0x265   : > { %v820_v61 = vsub.f32 %v804_v58, %v812_v28  ;;  %v818_v16 = vsub.f32 %v802_v59, %v810_v57 }
 0x266   : > { %v872_v62 = vmul.f32 0.5, %v871_v60 }
 0x267   : > { %v1174_v63 = vpop.eup %1173  ;;  %v828_v0 = vadd.f32 1e-05, %v820_v61  ;;  %v826_v2 = vadd.f32 1e-05, %v818_v16 }
 0x268   : > { %v873_v31 = vsub.f32 1.5, %v872_v62  ;;  %v890_v1 = vmul.f32 %v1174_v63, %v827_v46  ;;  %vm896_vm8 = vweird.f32 %v1174_v63 }
 0x269   : > { %1175 = vrsqrt.f32 %v828_v0  ;;  %vm897_vm10 = vmor %vm895_vm9, %vm896_vm8  ;;  %vm905_vm13 = vweird.f32 %v828_v0  ;;  %vm885_vm15 = vweird.f32 %v826_v2 }
 0x26a   : > { %v891_v3 = vmul.f32 %v1174_v63, %v890_v1  ;;  %1177 = vrsqrt.f32 %v826_v2  ;;  %v874_v4 = vmul.f32 %v1172_v50, %v873_v31 }
 0x26c   : > { %v892_v6 = vmul.f32 0.5, %v891_v3  ;;  %v878_v7 = vsel %vm877_vm7, %v1172_v50, %v874_v4 }
 0x26d   : > { %v921_v8 = vmul.f32 %v913_v5, %v878_v7 }
 0x26e   : > { %v893_v9 = vsub.f32 1.5, %v892_v6 }
 0x26f   : > { %v1176_v11 = vpop.eup %1175  ;;  %v932_v20 = vmul.f32 %v1538_v47, %v921_v8 }
 0x270   : > { %v1178_v27 = vpop.eup %1177  ;;  %v894_v10 = vmul.f32 %v1174_v63, %v893_v9  ;;  %v900_v35 = vmul.f32 %v1176_v11, %v828_v0  ;;  %vm906_vm11 = vweird.f32 %v1176_v11 }
 0x271   : > { %v880_v14 = vmul.f32 %v1178_v27, %v826_v2  ;;  %v943_v15 = vadd.f32 %v1543_v55, %v932_v20  ;;  %vm886_vm12 = vweird.f32 %v1178_v27  ;;  %vm907_vm14 = vmor %vm905_vm13, %vm906_vm11 }
 0x272   : > { %v901_v48 = vmul.f32 %v1176_v11, %v900_v35  ;;  %v898_v17 = vsel %vm897_vm10, %v1174_v63, %v894_v10  ;;  %vm887_vm0 = vmor %vm885_vm15, %vm886_vm12 }
 0x273   : > { %v881_v18 = vmul.f32 %v1178_v27, %v880_v14  ;;  %995 = vmatmul.f32.gmra.mxu2 %v943_v15  ;;  %v923_v19 = vmul.f32 %v915_v12, %v898_v17 }
 0x274   : > { %v902_v21 = vmul.f32 0.5, %v901_v48 }
 0x275   : > { %v882_v34 = vmul.f32 0.5, %v881_v18  ;;  %v934_v22 = vmul.f32 %v1538_v47, %v923_v19 }
 0x276   : > { %v903_v37 = vsub.f32 1.5, %v902_v21 }
 0x277   : > { %v883_v23 = vsub.f32 1.5, %v882_v34  ;;  %v945_v25 = vadd.f32 %v1543_v55, %v934_v22 }
 0x278   : > { %v904_v45 = vmul.f32 %v1176_v11, %v903_v37 }
 0x279   : > { %1001 = vmatmul.f32.vlgmr.msrb.gmra.mxu3 %v945_v25  ;;  %v884_v26 = vmul.f32 %v1178_v27, %v883_v23 }
 0x27a   : > { %v908_v24 = vsel %vm907_vm14, %v1176_v11, %v904_v45 }
 0x27b   : > { %v888_v32 = vsel %vm887_vm0, %v1178_v27, %v884_v26  ;;  %v924_v42 = vmul.f32 %v916_v40, %v908_v24 }
 0x27c   : > { %v922_v30 = vmul.f32 %v914_v29, %v888_v32 }
 0x27d   : > { %v935_v33 = vmul.f32 %v1538_v47, %v924_v42 }
 0x27e   : > { %v933_v36 = vmul.f32 %v1538_v47, %v922_v30 }
 0x27f   : > { %v946_v38 = vadd.f32 %v1543_v55, %v935_v33 }
 0x280   : > { %v944_v56 = vadd.f32 %v1543_v55, %v933_v36 }
 0x281   : > { %1004 = vmatmul.f32.gmra.mxu3 %v946_v38 }
 0x282   : > { %998 = vmatmul.f32.gmra.mxu2 %v944_v56 }
 0x2c4   : > { %v984_v41 = vpop.f32.mrf.mxu2 }
 0x2c5   : > { %v985_v39 = vadd.f32 %v1146_v52, %v984_v41 }
 0x2c7   : > { %1179 = vtanh.f32 %v985_v39 }
 0x2cc   : > { %v987_v47 = vpop.f32.mrf.mxu2 }
 0x2cd   : > { %v1180_v55 = vpop.eup %1179  ;;  %v988_v13 = vadd.f32 %v1146_v52, %v987_v47 }
 0x2ce   : > { %1017 = vst.msk [vmem:[%s1586_s28] sm:$0xff] %vm1016_vm1, %v1180_v55 }
 0x2cf   : > { %1181 = vtanh.f32 %v988_v13 }
 0x2d4   : > { %v990_v43 = vpop.f32.mrf.mxu2 }
 0x2d5   : > { %v1182_v44 = vpop.eup %1181  ;;  %v991_v46 = vadd.f32 %v1146_v52, %v990_v43 }
 0x2d6   : > { %1018 = vst.msk [vmem:[%s1586_s28 + $0x8] sm:$0xff] %vm1016_vm1, %v1182_v44 }
 0x2d7   : > { %1183 = vtanh.f32 %v991_v46 }
 0x2dc   : > { %v993_v50 = vpop.f32.mrf.mxu2 }
 0x2dd   : > { %v1184_v49 = vpop.eup %1183  ;;  %v994_v51 = vadd.f32 %v1146_v52, %v993_v50 }
 0x2de   : > { %1019 = vst.msk [vmem:[%s1586_s28 + $0x10] sm:$0xff] %vm1016_vm1, %v1184_v49 }
 0x2df   : > { %1185 = vtanh.f32 %v994_v51 }
 0x2e5   : > { %v1186_v53 = vpop.eup %1185 }
 0x2e6   : > { %1020 = vst.msk [vmem:[%s1586_s28 + $0x18] sm:$0xff] %vm1016_vm1, %v1186_v53 }
 0x2f6   : > { %v996_v54 = vpop.f32.mrf.mxu2 }
 0x2f7   : > { %v997_v57 = vadd.f32 %v1146_v52, %v996_v54 }
 0x2f9   : > { %1187 = vtanh.f32 %v997_v57 }
 0x2fc   : > { %v1002_v28 = vpop.f32.mrf.mxu3 }
 0x2fd   : > { %v1003_v58 = vadd.f32 %v1146_v52, %v1002_v28 }
 0x2ff   : > { %v1188_v59 = vpop.eup %1187  ;;  %1189 = vtanh.f32 %v1003_v58 }
 0x300   : > { %1021 = vst.msk [vmem:[%s1586_s28 + $0x20] sm:$0xff] %vm1016_vm1, %v1188_v59 }
 0x304   : > { %v1005_v60 = vpop.f32.mrf.mxu3 }
 0x305   : > { %v1190_v61 = vpop.eup %1189  ;;  %v999_v16 = vpop.f32.mrf.mxu2  ;;  %v1006_v62 = vadd.f32 %v1146_v52, %v1005_v60 }
 0x306   : > { %1023 = vst.msk [vmem:[%s1586_s28 + $0x30] sm:$0xff] %vm1016_vm1, %v1190_v61  ;;  %v1000_v63 = vadd.f32 %v1146_v52, %v999_v16 }
 0x307   : > { %1191 = vtanh.f32 %v1006_v62 }
 0x308   : > { %1193 = vtanh.f32 %v1000_v63 }
 0x30d   : > { %v1192_v0 = vpop.eup %1191 }
 0x30e   : > { %v1194_v2 = vpop.eup %1193  ;;  %1024 = vst.msk [vmem:[%s1586_s28 + $0x38] sm:$0xff] %vm1016_vm1, %v1192_v0 }
 0x30f   : > { %1022 = vst.msk [vmem:[%s1586_s28 + $0x28] sm:$0xff] %vm1016_vm1, %v1194_v2 }
 0x310 PF: > { %s21_s17 = sadd.s32 1, %s1201_s17  }
 0x311   : > { %p18_p4 = scmp.ge.s32.totalorder %s21_s17, 4  }
 0x313   :  { %20 = sbr.rel (!%p18_p4) target bundleno = 1 (0x1), region = 94 }

</bundles_post_ra>
